<compile_context>
chip_gen: v7x
topology: tpu7x:2x2x1
jax: 0.10.0
libtpu: 0.0.40
codegen_flags: <defaults>
</compile_context>

<pallas_src>
import functools

import jax
import jax.numpy as jnp
from jax.experimental import pallas as pl
from jax.experimental.pallas import tpu as pltpu


def _round_up(x, m):
    return (x + m - 1) // m * m


def _fused_deconv_bn_elu_kernel(x_ref, w_ref, b_ref, g_ref, be_ref, m_ref, o_ref,
                                *, K, W_pad, NL, count, with_bn, with_relu, eps):
    """Single-step fused transposed-conv + BatchNorm(train) + ELU.

    x_ref  : (Cin, NL)        bf16 zero-padded input, flattened per image with
                              row stride W_pad; each image chunk is Lp lanes
                              (multiple of 128), batch concatenated on lanes.
    w_ref  : (K*K, Cout, Cin) bf16 spatially-flipped ConvTranspose2d weights.
    b_ref  : (Cout, 1)        f32 conv bias (only used when with_bn=False).
    g_ref, be_ref : (Cout, 1) f32 BN gamma / beta.
    m_ref  : (1, NL)          f32 validity mask (1.0 at real output pixels).
    o_ref  : (Cout, NL)       f32 output in the same padded-flat layout.
    """
    # Roll in f32 (guaranteed lane-rotate lowering), cast back to bf16 for the
    # MXU dot; bf16<->f32 round-trip is exact so no extra error.
    x32 = x_ref[...].astype(jnp.float32)                       # (Cin, NL)
    cout = o_ref.shape[0]
    acc = jnp.zeros((cout, NL), jnp.float32)

    # out[p] = sum_{kh,kw} W_flip[kh,kw] @ x_pad_flat[p + kh*W_pad + kw].
    # The shift is a circular lane roll; valid output positions never read past
    # their own image chunk by construction, so wraparound only touches lanes
    # that the wrapper slices away and the BN mask zeroes out.
    for kh in range(K):
        for kw in range(K):
            s = kh * W_pad + kw
            xs = x32 if s == 0 else pltpu.roll(x32, shift=NL - s, axis=1)
            acc = acc + jnp.dot(w_ref[kh * K + kw], xs.astype(jnp.bfloat16),
                                preferred_element_type=jnp.float32)

    if not with_bn:
        acc = acc + b_ref[...]           # bias cancels exactly under batch norm

    y = acc
    if with_bn:
        mask = m_ref[...]                                      # (1, NL)
        s1 = jnp.sum(acc * mask, axis=1, keepdims=True)        # (Cout, 1)
        s2 = jnp.sum(acc * acc * mask, axis=1, keepdims=True)
        mean = s1 / count
        # TODO(synk): E[x^2]-E[x]^2 can cancel for very large N*HW; switch to
        # centered per-tile partials / Welford for production-scale batches.
        var = s2 / count - mean * mean                         # biased (torch train)
        scale = g_ref[...] * jax.lax.rsqrt(var + eps)
        shift = be_ref[...] - mean * scale
        y = y * scale + shift
    if with_relu:
        # exp(y)-1 kept instead of expm1 for guaranteed Mosaic lowering (ELU, a=1).
        y = jnp.where(y > 0, y, jnp.exp(y) - 1.0)
    o_ref[...] = y.astype(o_ref.dtype)


def basic_deconv(x_nchw, weight, bias, gamma, beta, *,
                 with_bn=True, with_relu=True, eps=1e-5):
    """Matches BasicDeconv.forward: ConvTranspose2d(stride=1, padding=0),
    BatchNorm2d in training mode (batch statistics, biased variance), ELU."""
    N, Cin, H, W = x_nchw.shape
    Cin_w, Cout, K, K2 = weight.shape
    assert Cin == Cin_w and K == K2
    H_out, W_out = H + K - 1, W + K - 1
    H_pad, W_pad = H + 2 * (K - 1), W + 2 * (K - 1)   # = H_out+K-1, W_out+K-1
    HWp = H_pad * W_pad
    Lp = _round_up(HWp, 128)                          # lane-dense per-image chunk
    NL = N * Lp

    # ---- glue (XLA): zero-pad, flatten with row stride W_pad, fold the batch
    #      into the lane axis.  No K^2 im2col blow-up is ever materialized. ----
    xp = jnp.pad(x_nchw.astype(jnp.float32),
                 ((0, 0), (0, 0), (K - 1, K - 1), (K - 1, K - 1)))
    xp = xp.reshape(N, Cin, HWp)
    xp = jnp.pad(xp, ((0, 0), (0, 0), (0, Lp - HWp)))
    x_flat = jnp.transpose(xp, (1, 0, 2)).reshape(Cin, NL).astype(jnp.bfloat16)

    # flipped weights, (kh,kw)-major: w_flat[kh*K+kw][co,ci] = W[ci,co,K-1-kh,K-1-kw]
    w_flat = jnp.transpose(jnp.flip(weight, axis=(2, 3)), (2, 3, 1, 0)) \
                .reshape(K * K, Cout, Cin).astype(jnp.bfloat16)

    b2 = bias.reshape(Cout, 1).astype(jnp.float32)
    g2 = gamma.reshape(Cout, 1).astype(jnp.float32)
    be2 = beta.reshape(Cout, 1).astype(jnp.float32)

    # validity mask of real output pixels inside one padded-flat image chunk
    p = jnp.arange(Lp)
    valid = (p < HWp) & ((p // W_pad) < H_out) & ((p % W_pad) < W_out)
    mask = jnp.tile(valid.astype(jnp.float32), (N,)).reshape(1, NL)
    count = float(N * H_out * W_out)

    # Single-pass fused path: whole batch resident in VMEM.
    est_bytes = (3 * Cin * 2 + 2 * Cout * 4 + 4) * NL + 4096
    # TODO(synk): for large N*HW*Cout switch to a two-pass tiled kernel
    # (per-tile BN partials + separate apply) and add a Cout-parallel grid axis
    # for v7x megacore; not needed at these shapes.
    assert est_bytes < 24 * 1024 * 1024, "workload too large for fused single-pass kernel"

    kernel = functools.partial(
        _fused_deconv_bn_elu_kernel,
        K=K, W_pad=W_pad, NL=NL, count=count,
        with_bn=with_bn, with_relu=with_relu, eps=eps)

    out_flat = pl.pallas_call(
        kernel,
        out_shape=jax.ShapeDtypeStruct((Cout, NL), jnp.float32),
        compiler_params=pltpu.CompilerParams(
            vmem_limit_bytes=int(min(64 * 1024 * 1024,
                                     max(16 * 1024 * 1024, 4 * est_bytes)))),
    )(x_flat, w_flat, b2, g2, be2, mask)

    # Slice valid pixels back out of the padded-flat layout -> NCHW.
    y = out_flat.reshape(Cout, N, Lp)[:, :, :HWp].reshape(Cout, N, H_pad, W_pad)
    y = y[:, :, :H_out, :W_out]
    return jnp.transpose(y, (1, 0, 2, 3))
    # TODO(synk): torch BN also updates running_mean/var as a side effect; that
    # state mutation does not affect the forward output and is not reproduced.


def _reference(x_nchw, weight, bias, gamma, beta, eps=1e-5):
    N, Cin, H, W = x_nchw.shape
    _, Cout, K, _ = weight.shape
    H_out, W_out = H + K - 1, W + K - 1
    x = jnp.transpose(x_nchw, (0, 2, 3, 1))
    ref = jnp.zeros((N, H_out, W_out, Cout), jnp.float32)
    for kh in range(K):
        for kw in range(K):
            ref = ref.at[:, kh:kh + H, kw:kw + W, :].add(
                jnp.einsum('nhwc,co->nhwo', x, weight[:, :, kh, kw]))
    ref = ref + bias
    mean = ref.mean(axis=(0, 1, 2))
    var = ref.var(axis=(0, 1, 2))
    ref = (ref - mean) / jnp.sqrt(var + eps) * gamma + beta
    ref = jnp.where(ref > 0, ref, jnp.exp(ref) - 1.0)
    return jnp.transpose(ref, (0, 3, 1, 2))


if __name__ == "__main__":
    key = jax.random.PRNGKey(0)
    k1, k2, k3, k4, k5 = jax.random.split(key, 5)

    N, Cin, Cout, H, W, K = 2, 4, 8, 16, 16, 3
    x = jax.random.normal(k1, (N, Cin, H, W), jnp.float32)
    weight = 0.1 * jax.random.normal(k2, (Cin, Cout, K, K), jnp.float32)  # torch ConvTranspose2d layout
    bias = 0.1 * jax.random.normal(k3, (Cout,), jnp.float32)
    gamma = 1.0 + 0.1 * jax.random.normal(k4, (Cout,), jnp.float32)
    beta = 0.1 * jax.random.normal(k5, (Cout,), jnp.float32)

    out = basic_deconv(x, weight, bias, gamma, beta, with_bn=True, with_relu=True)
    out = jax.block_until_ready(out)

    ref = _reference(x, weight, bias, gamma, beta)
    assert out.shape == (N, Cout, H + K - 1, W + K - 1), out.shape
    err = float(jnp.max(jnp.abs(out - ref)))
    # bf16 MXU operands (per perf review) vs f32 reference -> ~1e-2 worst case.
    assert jnp.allclose(out, ref, atol=2e-2, rtol=2e-2), err

    print("KERNEL_OK")
</pallas_src>

<mosaic_0001>
module attributes {stable_mosaic.version = 11 : i64} {
  func.func @_fused_deconv_bn_elu_kernel(%arg0: memref<4x1024xbf16, #tpu.memory_space<vmem>>, %arg1: memref<9x8x4xbf16, #tpu.memory_space<vmem>>, %arg2: memref<8x1xf32, #tpu.memory_space<vmem>>, %arg3: memref<8x1xf32, #tpu.memory_space<vmem>>, %arg4: memref<8x1xf32, #tpu.memory_space<vmem>>, %arg5: memref<1x1024xf32, #tpu.memory_space<vmem>>, %arg6: memref<8x1024xf32, #tpu.memory_space<vmem>>) attributes {dimension_semantics = [], scalar_prefetch = 0 : i64, scratch_operands = 0 : i64, tpu.core_type = #tpu.core_type<tc>} {
    %c0 = arith.constant 0 : index
    %c0_0 = arith.constant 0 : index
    %0 = vector.load %arg0[%c0, %c0_0] : memref<4x1024xbf16, #tpu.memory_space<vmem>>, vector<4x1024xbf16>
    %1 = arith.extf %0 : vector<4x1024xbf16> to vector<4x1024xf32>
    %cst = arith.constant 0.000000e+00 : f32
    %2 = vector.broadcast %cst : f32 to vector<8x1024xf32>
    %c0_1 = arith.constant 0 : index
    %c0_2 = arith.constant 0 : index
    %c0_3 = arith.constant 0 : index
    %3 = vector.load %arg1[%c0_1, %c0_2, %c0_3] : memref<9x8x4xbf16, #tpu.memory_space<vmem>>, vector<1x8x4xbf16>
    %4 = vector.shape_cast %3 : vector<1x8x4xbf16> to vector<8x4xbf16>
    %5 = arith.truncf %1 : vector<4x1024xf32> to vector<4x1024xbf16>
    %cst_4 = arith.constant dense<0.000000e+00> : vector<8x1024xf32>
    %6 = tpu.matmul %4, %5, %cst_4 {dimension_numbers = #tpu.dot_dimension_numbers<[1], [0], [0], [1], [0, 0, 1, 1], [], []>} : vector<8x4xbf16>, vector<4x1024xbf16>, vector<8x1024xf32> -> vector<8x1024xf32>
    %7 = arith.addf %2, %6 : vector<8x1024xf32>
    %c1023_i32 = arith.constant 1023 : i32
    %8 = tpu.dynamic_rotate %1 by %c1023_i32 dim 1 : vector<4x1024xf32>, i32 -> vector<4x1024xf32>
    %c1 = arith.constant 1 : index
    %c0_5 = arith.constant 0 : index
    %c0_6 = arith.constant 0 : index
    %9 = vector.load %arg1[%c1, %c0_5, %c0_6] : memref<9x8x4xbf16, #tpu.memory_space<vmem>>, vector<1x8x4xbf16>
    %10 = vector.shape_cast %9 : vector<1x8x4xbf16> to vector<8x4xbf16>
    %11 = arith.truncf %8 : vector<4x1024xf32> to vector<4x1024xbf16>
    %cst_7 = arith.constant dense<0.000000e+00> : vector<8x1024xf32>
    %12 = tpu.matmul %10, %11, %cst_7 {dimension_numbers = #tpu.dot_dimension_numbers<[1], [0], [0], [1], [0, 0, 1, 1], [], []>} : vector<8x4xbf16>, vector<4x1024xbf16>, vector<8x1024xf32> -> vector<8x1024xf32>
    %13 = arith.addf %7, %12 : vector<8x1024xf32>
    %c1022_i32 = arith.constant 1022 : i32
    %14 = tpu.dynamic_rotate %1 by %c1022_i32 dim 1 : vector<4x1024xf32>, i32 -> vector<4x1024xf32>
    %c2 = arith.constant 2 : index
    %c0_8 = arith.constant 0 : index
    %c0_9 = arith.constant 0 : index
    %15 = vector.load %arg1[%c2, %c0_8, %c0_9] : memref<9x8x4xbf16, #tpu.memory_space<vmem>>, vector<1x8x4xbf16>
    %16 = vector.shape_cast %15 : vector<1x8x4xbf16> to vector<8x4xbf16>
    %17 = arith.truncf %14 : vector<4x1024xf32> to vector<4x1024xbf16>
    %cst_10 = arith.constant dense<0.000000e+00> : vector<8x1024xf32>
    %18 = tpu.matmul %16, %17, %cst_10 {dimension_numbers = #tpu.dot_dimension_numbers<[1], [0], [0], [1], [0, 0, 1, 1], [], []>} : vector<8x4xbf16>, vector<4x1024xbf16>, vector<8x1024xf32> -> vector<8x1024xf32>
    %19 = arith.addf %13, %18 : vector<8x1024xf32>
    %c1004_i32 = arith.constant 1004 : i32
    %20 = tpu.dynamic_rotate %1 by %c1004_i32 dim 1 : vector<4x1024xf32>, i32 -> vector<4x1024xf32>
    %c3 = arith.constant 3 : index
    %c0_11 = arith.constant 0 : index
    %c0_12 = arith.constant 0 : index
    %21 = vector.load %arg1[%c3, %c0_11, %c0_12] : memref<9x8x4xbf16, #tpu.memory_space<vmem>>, vector<1x8x4xbf16>
    %22 = vector.shape_cast %21 : vector<1x8x4xbf16> to vector<8x4xbf16>
    %23 = arith.truncf %20 : vector<4x1024xf32> to vector<4x1024xbf16>
    %cst_13 = arith.constant dense<0.000000e+00> : vector<8x1024xf32>
    %24 = tpu.matmul %22, %23, %cst_13 {dimension_numbers = #tpu.dot_dimension_numbers<[1], [0], [0], [1], [0, 0, 1, 1], [], []>} : vector<8x4xbf16>, vector<4x1024xbf16>, vector<8x1024xf32> -> vector<8x1024xf32>
    %25 = arith.addf %19, %24 : vector<8x1024xf32>
    %c1003_i32 = arith.constant 1003 : i32
    %26 = tpu.dynamic_rotate %1 by %c1003_i32 dim 1 : vector<4x1024xf32>, i32 -> vector<4x1024xf32>
    %c4 = arith.constant 4 : index
    %c0_14 = arith.constant 0 : index
    %c0_15 = arith.constant 0 : index
    %27 = vector.load %arg1[%c4, %c0_14, %c0_15] : memref<9x8x4xbf16, #tpu.memory_space<vmem>>, vector<1x8x4xbf16>
    %28 = vector.shape_cast %27 : vector<1x8x4xbf16> to vector<8x4xbf16>
    %29 = arith.truncf %26 : vector<4x1024xf32> to vector<4x1024xbf16>
    %cst_16 = arith.constant dense<0.000000e+00> : vector<8x1024xf32>
    %30 = tpu.matmul %28, %29, %cst_16 {dimension_numbers = #tpu.dot_dimension_numbers<[1], [0], [0], [1], [0, 0, 1, 1], [], []>} : vector<8x4xbf16>, vector<4x1024xbf16>, vector<8x1024xf32> -> vector<8x1024xf32>
    %31 = arith.addf %25, %30 : vector<8x1024xf32>
    %c1002_i32 = arith.constant 1002 : i32
    %32 = tpu.dynamic_rotate %1 by %c1002_i32 dim 1 : vector<4x1024xf32>, i32 -> vector<4x1024xf32>
    %c5 = arith.constant 5 : index
    %c0_17 = arith.constant 0 : index
    %c0_18 = arith.constant 0 : index
    %33 = vector.load %arg1[%c5, %c0_17, %c0_18] : memref<9x8x4xbf16, #tpu.memory_space<vmem>>, vector<1x8x4xbf16>
    %34 = vector.shape_cast %33 : vector<1x8x4xbf16> to vector<8x4xbf16>
    %35 = arith.truncf %32 : vector<4x1024xf32> to vector<4x1024xbf16>
    %cst_19 = arith.constant dense<0.000000e+00> : vector<8x1024xf32>
    %36 = tpu.matmul %34, %35, %cst_19 {dimension_numbers = #tpu.dot_dimension_numbers<[1], [0], [0], [1], [0, 0, 1, 1], [], []>} : vector<8x4xbf16>, vector<4x1024xbf16>, vector<8x1024xf32> -> vector<8x1024xf32>
    %37 = arith.addf %31, %36 : vector<8x1024xf32>
    %c984_i32 = arith.constant 984 : i32
    %38 = tpu.dynamic_rotate %1 by %c984_i32 dim 1 : vector<4x1024xf32>, i32 -> vector<4x1024xf32>
    %c6 = arith.constant 6 : index
    %c0_20 = arith.constant 0 : index
    %c0_21 = arith.constant 0 : index
    %39 = vector.load %arg1[%c6, %c0_20, %c0_21] : memref<9x8x4xbf16, #tpu.memory_space<vmem>>, vector<1x8x4xbf16>
    %40 = vector.shape_cast %39 : vector<1x8x4xbf16> to vector<8x4xbf16>
    %41 = arith.truncf %38 : vector<4x1024xf32> to vector<4x1024xbf16>
    %cst_22 = arith.constant dense<0.000000e+00> : vector<8x1024xf32>
    %42 = tpu.matmul %40, %41, %cst_22 {dimension_numbers = #tpu.dot_dimension_numbers<[1], [0], [0], [1], [0, 0, 1, 1], [], []>} : vector<8x4xbf16>, vector<4x1024xbf16>, vector<8x1024xf32> -> vector<8x1024xf32>
    %43 = arith.addf %37, %42 : vector<8x1024xf32>
    %c983_i32 = arith.constant 983 : i32
    %44 = tpu.dynamic_rotate %1 by %c983_i32 dim 1 : vector<4x1024xf32>, i32 -> vector<4x1024xf32>
    %c7 = arith.constant 7 : index
    %c0_23 = arith.constant 0 : index
    %c0_24 = arith.constant 0 : index
    %45 = vector.load %arg1[%c7, %c0_23, %c0_24] : memref<9x8x4xbf16, #tpu.memory_space<vmem>>, vector<1x8x4xbf16>
    %46 = vector.shape_cast %45 : vector<1x8x4xbf16> to vector<8x4xbf16>
    %47 = arith.truncf %44 : vector<4x1024xf32> to vector<4x1024xbf16>
    %cst_25 = arith.constant dense<0.000000e+00> : vector<8x1024xf32>
    %48 = tpu.matmul %46, %47, %cst_25 {dimension_numbers = #tpu.dot_dimension_numbers<[1], [0], [0], [1], [0, 0, 1, 1], [], []>} : vector<8x4xbf16>, vector<4x1024xbf16>, vector<8x1024xf32> -> vector<8x1024xf32>
    %49 = arith.addf %43, %48 : vector<8x1024xf32>
    %c982_i32 = arith.constant 982 : i32
    %50 = tpu.dynamic_rotate %1 by %c982_i32 dim 1 : vector<4x1024xf32>, i32 -> vector<4x1024xf32>
    %c8 = arith.constant 8 : index
    %c0_26 = arith.constant 0 : index
    %c0_27 = arith.constant 0 : index
    %51 = vector.load %arg1[%c8, %c0_26, %c0_27] : memref<9x8x4xbf16, #tpu.memory_space<vmem>>, vector<1x8x4xbf16>
    %52 = vector.shape_cast %51 : vector<1x8x4xbf16> to vector<8x4xbf16>
    %53 = arith.truncf %50 : vector<4x1024xf32> to vector<4x1024xbf16>
    %cst_28 = arith.constant dense<0.000000e+00> : vector<8x1024xf32>
    %54 = tpu.matmul %52, %53, %cst_28 {dimension_numbers = #tpu.dot_dimension_numbers<[1], [0], [0], [1], [0, 0, 1, 1], [], []>} : vector<8x4xbf16>, vector<4x1024xbf16>, vector<8x1024xf32> -> vector<8x1024xf32>
    %55 = arith.addf %49, %54 : vector<8x1024xf32>
    %c0_29 = arith.constant 0 : index
    %c0_30 = arith.constant 0 : index
    %56 = vector.load %arg5[%c0_29, %c0_30] : memref<1x1024xf32, #tpu.memory_space<vmem>>, vector<1x1024xf32>
    %57 = vector.broadcast %56 : vector<1x1024xf32> to vector<8x1024xf32>
    %58 = arith.mulf %55, %57 : vector<8x1024xf32>
    %cst_31 = arith.constant dense<0.000000e+00> : vector<8xf32>
    %59 = vector.multi_reduction <add>, %58, %cst_31 [1] : vector<8x1024xf32> to vector<8xf32>
    %60 = vector.shape_cast %59 : vector<8xf32> to vector<8x1xf32>
    %61 = arith.mulf %55, %55 : vector<8x1024xf32>
    %62 = vector.broadcast %56 : vector<1x1024xf32> to vector<8x1024xf32>
    %63 = arith.mulf %61, %62 : vector<8x1024xf32>
    %cst_32 = arith.constant dense<0.000000e+00> : vector<8xf32>
    %64 = vector.multi_reduction <add>, %63, %cst_32 [1] : vector<8x1024xf32> to vector<8xf32>
    %65 = vector.shape_cast %64 : vector<8xf32> to vector<8x1xf32>
    %cst_33 = arith.constant 6.480000e+02 : f32
    %66 = vector.broadcast %cst_33 : f32 to vector<8x1xf32>
    %67 = arith.divf %60, %66 : vector<8x1xf32>
    %cst_34 = arith.constant 6.480000e+02 : f32
    %68 = vector.broadcast %cst_34 : f32 to vector<8x1xf32>
    %69 = arith.divf %65, %68 : vector<8x1xf32>
    %70 = arith.mulf %67, %67 : vector<8x1xf32>
    %71 = arith.subf %69, %70 : vector<8x1xf32>
    %c0_35 = arith.constant 0 : index
    %c0_36 = arith.constant 0 : index
    %72 = vector.load %arg3[%c0_35, %c0_36] : memref<8x1xf32, #tpu.memory_space<vmem>>, vector<8x1xf32>
    %cst_37 = arith.constant 9.99999974E-6 : f32
    %73 = vector.broadcast %cst_37 : f32 to vector<8x1xf32>
    %74 = arith.addf %71, %73 : vector<8x1xf32>
    %75 = math.rsqrt %74 : vector<8x1xf32>
    %76 = arith.mulf %72, %75 : vector<8x1xf32>
    %c0_38 = arith.constant 0 : index
    %c0_39 = arith.constant 0 : index
    %77 = vector.load %arg4[%c0_38, %c0_39] : memref<8x1xf32, #tpu.memory_space<vmem>>, vector<8x1xf32>
    %78 = arith.mulf %67, %76 : vector<8x1xf32>
    %79 = arith.subf %77, %78 : vector<8x1xf32>
    %80 = vector.broadcast %76 : vector<8x1xf32> to vector<8x1024xf32>
    %81 = arith.mulf %55, %80 : vector<8x1024xf32>
    %82 = vector.broadcast %79 : vector<8x1xf32> to vector<8x1024xf32>
    %83 = arith.addf %81, %82 : vector<8x1024xf32>
    %cst_40 = arith.constant 0.000000e+00 : f32
    %84 = vector.broadcast %cst_40 : f32 to vector<8x1024xf32>
    %85 = arith.cmpf ogt, %83, %84 : vector<8x1024xf32>
    %86 = math.exp %83 : vector<8x1024xf32>
    %cst_41 = arith.constant 1.000000e+00 : f32
    %87 = vector.broadcast %cst_41 : f32 to vector<8x1024xf32>
    %88 = arith.subf %86, %87 : vector<8x1024xf32>
    %89 = arith.select %85, %83, %88 : vector<8x1024xi1>, vector<8x1024xf32>
    %c0_42 = arith.constant 0 : index
    %c0_43 = arith.constant 0 : index
    %90 = vector.load %arg6[%c0_42, %c0_43] : memref<8x1024xf32, #tpu.memory_space<vmem>>, vector<8x1024xf32>
    tpu.vector_store %arg6[%c0_42, %c0_43], %89 {strides = array<i32>} : memref<8x1024xf32, #tpu.memory_space<vmem>>, vector<8x1024xf32>,
    return
  }
}

</mosaic_0001>

<bundles_post_ra>
// kernel: tpu_custom_call.1
= control target key start
LH: loop header
LB: loop body
LE: loop exit
PB: predicated region body
PF: predicated region fallthrough
CT: control target
= control target key end

     0   :  { %s3169_s0 = inlined_call_operand.vmem [shape: bf16[4,1024], index: 0, kind: input, shape index: {}]   ;;  %s3170_s1 = inlined_call_operand.vmem [shape: bf16[9,8,4], index: 1, kind: input, shape index: {}]   ;;  %s3171_s2 = inlined_call_operand.vmem [shape: f32[8,1], index: 2, kind: input, shape index: {}]   ;;  %s3172_s3 = inlined_call_operand.vmem [shape: f32[8,1], index: 3, kind: input, shape index: {}]   ;;  %s3173_s4 = inlined_call_operand.vmem [shape: f32[8,1], index: 4, kind: input, shape index: {}]   ;;  %s3174_s5 = inlined_call_operand.vmem [shape: f32[1,1024], index: 5, kind: input, shape index: {}]   ;;  %s3175_s6 = inlined_call_operand.hbm [shape: f32[8,1024], index: 6, kind: output, shape index: {}]  }
   0x1   :  { %v2765_v0 = vld [vmem:[%s3169_s0] sm:$0xff]  ;;  %v2770_v1 = vld [vmem:[%s3169_s0 + $0x8] sm:$0xff] }
   0x2   :  { %v28_v2 = vunpack.c.h.bf16 %v2765_v0  ;;  %v29_v3 = vunpack.c.l.bf16 %v2770_v1  ;;  %v27_v4 = vunpack.c.l.bf16 %v2765_v0 }
   0x3   :  { %11 = vsyncpa [#allocation3], 0  ;;  %v30_v7 = vunpack.c.h.bf16 %v2770_v1  ;;  %v2716_v11 = vmov 0   ;;  %s2717_s0 = smov 127   ;;  %s2718_s2 = smov 126   ;;  %v60_v14 = vlaneseq  ;;  %v276_v29 = vcombine.high %v2765_v0, %v2765_v0 }
   0x4   :  { %v37_v5 = vcombine.high %v28_v2, %v28_v2  ;;  %v36_v6 = vcombine.high %v27_v4, %v27_v4  ;;  %v38_v8 = vcombine.high %v29_v3, %v29_v3  ;;  %142 = vmatprep.mubr.bf16.mxu0 %v2716_v11  ;;  %183 = vmatprep.mubr.bf16.mxu1 %v2716_v11  ;;  %s2719_s25 = smov 108   ;;  %s2720_s26 = smov 107   ;;  %v2725_v15 = vmov 1983009808   ;;  %v2323_v51 = vld [vmem:[%s3170_s1 + $0x4] sm:$0xf] }
   0x5   :  { %2670 = vset.pattern.permute.xlu0 %v2716_v11  ;;  %2671 = vset.pattern.permute.xlu1 %v2716_v11  ;;  %v39_v13 = vcombine.high %v30_v7, %v30_v7  ;;  %s2721_s27 = smov 106   ;;  %s2722_s28 = smov 88   ;;  %v278_v16 = vunpack.c.l.s4 %v2725_v15  ;;  %v2780_v17 = vand.u32 127, %v60_v14  ;;  %v2782_v19 = vshrl.u32 %v60_v14, 7 }
   0x6   :  { %v2555_v9 = vpack.i.bf16 %v29_v3, %v37_v5  ;;  %v2550_v10 = vpack.i.bf16 %v36_v6, %v27_v4  ;;  %v2560_v12 = vpack.i.bf16 %v30_v7, %v38_v8  ;;  %s2723_s29 = smov 87   ;;  %s2724_s30 = smov 86   ;;  %vm85_vm1 = vcmask 1041408  }
   0x7   :  { %v279_v18 = vunpack.c.0.s8 %v278_v16  ;;  %vm62_vm0 = vcmp.lt.s32.totalorder %v2780_v17, 127  ;;  %vm81_vm2 = vcmask 31744   ;;  %v293_v57 = vcombine.high %v2770_v1, %v2770_v1 }
   0x8   :  { %2556 = vrot.lane.b32.xlu1 %v2555_v9, %s2717_s0  ;;  %2551 = vrot.lane.b32.xlu0 %v2550_v10, %s2717_s0  ;;  %vm517_vm3 = vcmp.lt.s32.totalorder %v2780_v17, 126  ;;  %vm751_vm4 = vcmp.lt.s32.totalorder %v2780_v17, 108  ;;  %vm985_vm5 = vcmp.lt.s32.totalorder %v2780_v17, 107  ;;  %vm1219_vm6 = vcmp.lt.s32.totalorder %v2780_v17, 106 }
   0x9   :  { %v282_v28 = vsub.s32 %v279_v18, %v2782_v19  ;;  %vm1453_vm7 = vcmp.lt.s32.totalorder %v2780_v17, 88  ;;  %vm1687_vm8 = vcmp.lt.s32.totalorder %v2780_v17, 87  ;;  %vm1921_vm9 = vcmp.lt.s32.totalorder %v2780_v17, 86  ;;  %v2394_v17 = vld [vmem:[%s3170_s1 + $0x20] sm:$0xf] }
   0xb   :  { %v283_v42 = vrot.slane %v2765_v0, %v282_v28  ;;  %v290_v43 = vrot.slane %v276_v29, %v282_v28  ;;  %v300_v60 = vrot.slane %v2770_v1, %v282_v28  ;;  %v307_v61 = vrot.slane %v293_v57, %v282_v28 }
   0xc   :  { %2561 = vrot.lane.b32.xlu1 %v2560_v12, %s2717_s0  ;;  %48 = vrot.lane.b32.xlu0 %v28_v2, %s2717_s0 }
   0xd   :  { %v291_v55 = vcombine.high %v283_v42, %v283_v42  ;;  %v292_v59 = vcombine.high %v290_v43, %v290_v43  ;;  %v314_v0 = vsel %vm85_vm1, %v283_v42, 0  ;;  %v308_v3 = vcombine.high %v300_v60, %v300_v60 }
   0xe   :  { %v309_v4 = vcombine.high %v307_v61, %v307_v61  ;;  %v332_v14 = vsel %vm85_vm1, %v307_v61, 0 }
  0x10   :  { %58 = vrot.lane.b32.xlu0 %v39_v13, %s2717_s0  ;;  %2566 = vrot.lane.b32.xlu1 %v2550_v10, %s2718_s2 }
  0x14   :  { %2571 = vrot.lane.b32.xlu1 %v2555_v9, %s2718_s2  ;;  %505 = vrot.lane.b32.xlu0 %v28_v2, %s2718_s2 }
  0x18   :  { %515 = vrot.lane.b32.xlu1 %v39_v13, %s2718_s2  ;;  %2576 = vrot.lane.b32.xlu0 %v2560_v12, %s2718_s2 }
  0x1c   :  { %2581 = vrot.lane.b32.xlu0 %v2550_v10, %s2719_s25  ;;  %739 = vrot.lane.b32.xlu1 %v28_v2, %s2719_s25 }
  0x20   :  { %2586 = vrot.lane.b32.xlu0 %v2555_v9, %s2719_s25  ;;  %2591 = vrot.lane.b32.xlu1 %v2560_v12, %s2719_s25 }
  0x24   :  { %749 = vrot.lane.b32.xlu0 %v39_v13, %s2719_s25  ;;  %2596 = vrot.lane.b32.xlu1 %v2550_v10, %s2720_s26 }
  0x28   :  { %2601 = vrot.lane.b32.xlu1 %v2555_v9, %s2720_s26  ;;  %973 = vrot.lane.b32.xlu0 %v28_v2, %s2720_s26 }
  0x2c   :  { %983 = vrot.lane.b32.xlu1 %v39_v13, %s2720_s26  ;;  %2606 = vrot.lane.b32.xlu0 %v2560_v12, %s2720_s26 }
  0x30   :  { %2611 = vrot.lane.b32.xlu0 %v2550_v10, %s2721_s27  ;;  %1207 = vrot.lane.b32.xlu1 %v28_v2, %s2721_s27 }
  0x34   :  { %2616 = vrot.lane.b32.xlu0 %v2555_v9, %s2721_s27  ;;  %2621 = vrot.lane.b32.xlu1 %v2560_v12, %s2721_s27 }
  0x38   :  { %1217 = vrot.lane.b32.xlu0 %v39_v13, %s2721_s27  ;;  %2626 = vrot.lane.b32.xlu1 %v2550_v10, %s2722_s28 }
  0x3c   :  { %2631 = vrot.lane.b32.xlu1 %v2555_v9, %s2722_s28  ;;  %1441 = vrot.lane.b32.xlu0 %v28_v2, %s2722_s28 }
  0x40   :  { %1451 = vrot.lane.b32.xlu1 %v39_v13, %s2722_s28  ;;  %2636 = vrot.lane.b32.xlu0 %v2560_v12, %s2722_s28 }
  0x44   :  { %2641 = vrot.lane.b32.xlu0 %v2550_v10, %s2723_s29  ;;  %1675 = vrot.lane.b32.xlu1 %v28_v2, %s2723_s29 }
  0x48   :  { %2646 = vrot.lane.b32.xlu0 %v2555_v9, %s2723_s29  ;;  %2651 = vrot.lane.b32.xlu1 %v2560_v12, %s2723_s29 }
  0x4c   :  { %1685 = vrot.lane.b32.xlu0 %v39_v13, %s2723_s29  ;;  %2656 = vrot.lane.b32.xlu1 %v2550_v10, %s2724_s30 }
  0x50   :  { %2661 = vrot.lane.b32.xlu1 %v2555_v9, %s2724_s30  ;;  %1909 = vrot.lane.b32.xlu0 %v28_v2, %s2724_s30  ;;  %v320_v2 = vsel %vm85_vm1, %v290_v43, 0 }
  0x54   :  { %1919 = vrot.lane.b32.xlu1 %v39_v13, %s2724_s30  ;;  %2666 = vrot.lane.b32.xlu0 %v2560_v12, %s2724_s30  ;;  %v31_v12 = vld [vmem:[%s3170_s1] sm:$0xf]  ;;  %v326_v13 = vsel %vm85_vm1, %v300_v60, 0 }
  0x7a   :  { %v2557_v20 = vpop.permute.xlu1 %2556  ;;  %v2552_v21 = vpop.permute.xlu0 %2551 }
  0x7b   :  { %v2559_v22 = vunpack.i.h.bf16 %v2557_v20  ;;  %v2558_v23 = vunpack.i.l.bf16 %v2557_v20  ;;  %v2554_v24 = vunpack.i.h.bf16 %v2552_v21  ;;  %v2553_v25 = vunpack.i.l.bf16 %v2552_v21 }
  0x7d   :  { %v66_v26 = vsel %vm62_vm0, %v2558_v23, %v2559_v22  ;;  %v69_v27 = vsel %vm62_vm0, %v2553_v25, %v2554_v24 }
  0x7e   :  { %v2562_v30 = vpop.permute.xlu1 %2561  ;;  %v49_v31 = vpop.permute.xlu0 %48  ;;  %v76_v32 = vpack.c.bf16 %v66_v26, %v66_v26  ;;  %v73_v33 = vpack.c.bf16 %v69_v27, %v69_v27 }
  0x7f   :  { %v2564_v34 = vunpack.i.h.bf16 %v2562_v30  ;;  %v2563_v35 = vunpack.i.l.bf16 %v2562_v30  ;;  %v67_v36 = vsel %vm62_vm0, %v49_v31, %v2558_v23  ;;  %v68_v37 = vsel %vm62_vm0, %v2554_v24, %v49_v31 }
  0x80   :  { %v75_v38 = vpack.c.bf16 %v67_v36, %v67_v36  ;;  %2326 = vmatprep.subr.msk.bf16.mxu1 %vm85_vm1, %v76_v32  ;;  %v74_v39 = vpack.c.bf16 %v68_v37, %v68_v37  ;;  %v87_v46 = vsel %vm85_vm1, %v73_v33, 0 }
  0x81   :  { %v64_v40 = vsel %vm62_vm0, %v2563_v35, %v2564_v34  ;;  %v65_v41 = vsel %vm62_vm0, %v2559_v22, %v2563_v35 }
  0x82   :  { %v78_v44 = vpack.c.bf16 %v64_v40, %v64_v40  ;;  %v59_v45 = vpop.permute.xlu0 %58  ;;  %2324 = vmatprep.subr.msk.bf16.mxu0 %vm85_vm1, %v74_v39  ;;  %v93_v47 = vsel %vm85_vm1, %v75_v38, 0  ;;  %v77_v48 = vpack.c.bf16 %v65_v41, %v65_v41  ;;  %v2567_v56 = vpop.permute.xlu1 %2566 }
  0x83   :  { %v63_v49 = vsel %vm62_vm0, %v2564_v34, %v59_v45  ;;  %v70_v50 = vsel %vm62_vm0, %v59_v45, %v2553_v25  ;;  %111 = vmatpush1.bf16.msra.mxu0 %v87_v46  ;;  %152 = vmatpush1.bf16.msra.mxu1 %v93_v47  ;;  %v2569_v5 = vunpack.i.h.bf16 %v2567_v56  ;;  %v2568_v1 = vunpack.i.l.bf16 %v2567_v56  ;;  %v2340_v46 = vld [vmem:[%s3170_s1 + $0x8] sm:$0xf] }
  0x84   :  { %v79_v52 = vpack.c.bf16 %v63_v49, %v63_v49  ;;  %v80_v53 = vpack.c.bf16 %v70_v50, %v70_v50  ;;  %2328 = vmatprep.subr.msk.bf16.mxu0 %vm85_vm1, %v78_v44  ;;  %v99_v54 = vsel %vm85_vm1, %v77_v48, 0 }
  0x85   :  { %v524_v20 = vsel %vm517_vm3, %v2568_v1, %v2569_v5 }
  0x86   :  { %2325 = vmatmul.mubr.msk.bf16.vlgmr.msra.gmra.mrb[0].mxu0 %vm81_vm2, %v2323_v51  ;;  %2327 = vmatmul.mubr.msk.bf16.vlgmr.msra.gmra.mrb[0].mxu1 %vm81_vm2, %v2323_v51  ;;  %v105_v58 = vsel %vm85_vm1, %v79_v52, 0  ;;  %v2572_v62 = vpop.permute.xlu1 %2571  ;;  %v506_v63 = vpop.permute.xlu0 %505  ;;  %v528_v26 = vpack.c.bf16 %v524_v20, %v524_v20 }
  0x87   :  { %2330 = vmatprep.subr.msk.bf16.mxu1 %vm85_vm1, %v80_v53  ;;  %193 = vmatpush1.bf16.msra.mxu0 %v99_v54  ;;  %v2574_v6 = vunpack.i.h.bf16 %v2572_v62  ;;  %v2573_v7 = vunpack.i.l.bf16 %v2572_v62  ;;  %v523_v10 = vsel %vm517_vm3, %v2569_v5, %v506_v63 }
  0x88   :  { %234 = vmatpush1.bf16.msra.mxu1 %v105_v58  ;;  %224 = vmatprep.mubr.bf16.mxu0 %v2716_v11  ;;  %v529_v18 = vpack.c.bf16 %v523_v10, %v523_v10  ;;  %v540_v33 = vsel %vm85_vm1, %v528_v26, 0 }
  0x89   :  { %265 = vmatprep.mubr.bf16.mxu1 %v2716_v11  ;;  %2332 = vmatprep.subr.msk.bf16.mxu0 %vm85_vm1, %v291_v55  ;;  %v521_v9 = vsel %vm517_vm3, %v2573_v7, %v2574_v6  ;;  %v522_v16 = vsel %vm517_vm3, %v506_v63, %v2573_v7 }
  0x8a   :  { %2334 = vmatprep.subr.msk.bf16.mxu1 %vm85_vm1, %v292_v59  ;;  %v2577_v8 = vpop.permute.xlu0 %2576  ;;  %v531_v15 = vpack.c.bf16 %v521_v9, %v521_v9  ;;  %v516_v22 = vpop.permute.xlu1 %515  ;;  %v530_v25 = vpack.c.bf16 %v522_v16, %v522_v16 }
  0x8b   :  { %v2579_v23 = vunpack.i.h.bf16 %v2577_v8  ;;  %v2578_v24 = vunpack.i.l.bf16 %v2577_v8  ;;  %v525_v27 = vsel %vm517_vm3, %v516_v22, %v2568_v1 }
  0x8c   :  { %v535_v31 = vpack.c.bf16 %v525_v27, %v525_v27  ;;  %v546_v32 = vsel %vm85_vm1, %v530_v25, 0 }
  0x8d   :  { %v519_v28 = vsel %vm517_vm3, %v2578_v24, %v2579_v23  ;;  %v520_v35 = vsel %vm517_vm3, %v2574_v6, %v2578_v24  ;;  %v518_v36 = vsel %vm517_vm3, %v2579_v23, %v516_v22 }
  0x8e   :  { %2329 = vmatmul.mubr.msk.bf16.vlgmr.msra.gmra.mrb[4].mxu0 %vm81_vm2, %v2323_v51  ;;  %2331 = vmatmul.mubr.msk.bf16.vlgmr.msra.gmra.mrb[4].mxu1 %vm81_vm2, %v2323_v51  ;;  %v2847_v21 = vpop.permute.xlu0 %2581  ;;  %v740_v30 = vpop.permute.xlu1 %739  ;;  %v533_v34 = vpack.c.bf16 %v519_v28, %v519_v28  ;;  %v532_v40 = vpack.c.bf16 %v520_v35, %v520_v35  ;;  %v534_v41 = vpack.c.bf16 %v518_v36, %v518_v36 }
  0x8f   :  { %338 = vmatpush1.bf16.msra.mxu0 %v314_v0  ;;  %379 = vmatpush1.bf16.msra.mxu1 %v320_v2  ;;  %v2584_v37 = vunpack.i.h.bf16 %v2847_v21  ;;  %v2583_v42 = vunpack.i.l.bf16 %v2847_v21 }
  0x90   :  { %369 = vmatprep.mubr.bf16.mxu0 %v2716_v11  ;;  %410 = vmatprep.mubr.bf16.mxu1 %v2716_v11  ;;  %v552_v47 = vsel %vm85_vm1, %v532_v40, 0  ;;  %v558_v48 = vsel %vm85_vm1, %v534_v41, 0 }
  0x91   :  { %2336 = vmatprep.subr.msk.bf16.mxu0 %vm85_vm1, %v308_v3  ;;  %2338 = vmatprep.subr.msk.bf16.mxu1 %vm85_vm1, %v309_v4  ;;  %v757_v45 = vsel %vm751_vm4, %v2584_v37, %v740_v30  ;;  %v758_v52 = vsel %vm751_vm4, %v2583_v42, %v2584_v37 }
  0x92   :  { %v2587_v29 = vpop.permute.xlu0 %2586  ;;  %v2592_v43 = vpop.permute.xlu1 %2591  ;;  %v763_v51 = vpack.c.bf16 %v757_v45, %v757_v45  ;;  %v762_v58 = vpack.c.bf16 %v758_v52, %v758_v52 }
  0x93   :  { %v2589_v38 = vunpack.i.h.bf16 %v2587_v29  ;;  %v2588_v39 = vunpack.i.l.bf16 %v2587_v29  ;;  %v2594_v55 = vunpack.i.h.bf16 %v2592_v43  ;;  %v2593_v56 = vunpack.i.l.bf16 %v2592_v43 }
  0x94   :  { %v774_v2 = vsel %vm85_vm1, %v762_v58, 0 }
  0x95   :  { %v755_v44 = vsel %vm751_vm4, %v2588_v39, %v2589_v38  ;;  %v756_v50 = vsel %vm751_vm4, %v740_v30, %v2588_v39  ;;  %v753_v60 = vsel %vm751_vm4, %v2593_v56, %v2594_v55  ;;  %v754_v4 = vsel %vm751_vm4, %v2589_v38, %v2593_v56 }
  0x96   :  { %2333 = vmatmul.mubr.msk.bf16.vlgmr.msra.gmra.mrb[0].mxu0 %vm81_vm2, %v31_v12  ;;  %2335 = vmatmul.mubr.msk.bf16.vlgmr.msra.gmra.mrb[0].mxu1 %vm81_vm2, %v31_v12  ;;  %v765_v49 = vpack.c.bf16 %v755_v44, %v755_v44  ;;  %v2887_v53 = vpop.permute.xlu1 %2596  ;;  %v750_v54 = vpop.permute.xlu0 %749  ;;  %v764_v57 = vpack.c.bf16 %v756_v50, %v756_v50  ;;  %v767_v3 = vpack.c.bf16 %v753_v60, %v753_v60 }
  0x97   :  { %420 = vmatpush1.bf16.msra.mxu0 %v326_v13  ;;  %461 = vmatpush1.bf16.msra.mxu1 %v332_v14  ;;  %v759_v59 = vsel %vm751_vm4, %v750_v54, %v2583_v42  ;;  %v752_v5 = vsel %vm751_vm4, %v2594_v55, %v750_v54  ;;  %v2599_v6 = vunpack.i.h.bf16 %v2887_v53  ;;  %v766_v8 = vpack.c.bf16 %v754_v4, %v754_v4 }
  0x98   :  { %451 = vmatprep.mubr.bf16.mxu0 %v2716_v11  ;;  %492 = vmatprep.mubr.bf16.mxu1 %v2716_v11  ;;  %v769_v63 = vpack.c.bf16 %v759_v59, %v759_v59  ;;  %v780_v0 = vsel %vm85_vm1, %v764_v57, 0  ;;  %v768_v9 = vpack.c.bf16 %v752_v5, %v752_v5  ;;  %v2598_v10 = vunpack.i.l.bf16 %v2887_v53 }
  0x99   :  { %2343 = vmatprep.subr.msk.bf16.mxu1 %vm85_vm1, %v531_v15  ;;  %2341 = vmatprep.subr.msk.bf16.mxu0 %vm85_vm1, %v529_v18  ;;  %v2349_v15 = vld [vmem:[%s3170_s1 + $0xc] sm:$0xf]  ;;  %v786_v16 = vsel %vm85_vm1, %v766_v8, 0 }
  0x9a   :  { %v2602_v61 = vpop.permute.xlu1 %2601  ;;  %v974_v62 = vpop.permute.xlu0 %973  ;;  %v792_v18 = vsel %vm85_vm1, %v768_v9, 0  ;;  %v992_v23 = vsel %vm985_vm5, %v2598_v10, %v2599_v6 }
  0x9b   :  { %v2604_v7 = vunpack.i.h.bf16 %v2602_v61  ;;  %v2603_v1 = vunpack.i.l.bf16 %v2602_v61  ;;  %v991_v14 = vsel %vm985_vm5, %v2599_v6, %v974_v62  ;;  %v996_v29 = vpack.c.bf16 %v992_v23, %v992_v23 }
  0x9c   :  { %v997_v22 = vpack.c.bf16 %v991_v14, %v991_v14 }
  0x9d   :  { %v989_v13 = vsel %vm985_vm5, %v2603_v1, %v2604_v7  ;;  %v990_v21 = vsel %vm985_vm5, %v974_v62, %v2603_v1  ;;  %v1008_v36 = vsel %vm85_vm1, %v996_v29, 0 }
  0x9e   :  { %2337 = vmatmul.mubr.msk.bf16.vlgmr.msra.gmra.mrb[4].mxu0 %vm81_vm2, %v31_v12  ;;  %2339 = vmatmul.mubr.msk.bf16.vlgmr.msra.gmra.mrb[4].mxu1 %vm81_vm2, %v31_v12  ;;  %v2607_v12 = vpop.permute.xlu0 %2606  ;;  %v999_v20 = vpack.c.bf16 %v989_v13, %v989_v13  ;;  %v984_v25 = vpop.permute.xlu1 %983  ;;  %v998_v28 = vpack.c.bf16 %v990_v21, %v990_v21 }
  0x9f   :  { %605 = vmatpush1.bf16.msra.mxu1 %v546_v32  ;;  %564 = vmatpush1.bf16.msra.mxu0 %v540_v33  ;;  %v2609_v26 = vunpack.i.h.bf16 %v2607_v12  ;;  %v2608_v27 = vunpack.i.l.bf16 %v2607_v12  ;;  %v993_v30 = vsel %vm985_vm5, %v984_v25, %v2598_v10 }
  0xa0   :  { %2347 = vmatprep.subr.msk.bf16.mxu1 %vm85_vm1, %v535_v31  ;;  %595 = vmatprep.mubr.bf16.mxu0 %v2716_v11  ;;  %v1014_v35 = vsel %vm85_vm1, %v998_v28, 0 }
  0xa1   :  { %636 = vmatprep.mubr.bf16.mxu1 %v2716_v11  ;;  %2345 = vmatprep.subr.msk.bf16.mxu0 %vm85_vm1, %v533_v34  ;;  %v987_v31 = vsel %vm985_vm5, %v2608_v27, %v2609_v26  ;;  %v1003_v34 = vpack.c.bf16 %v993_v30, %v993_v30  ;;  %v988_v38 = vsel %vm985_vm5, %v2604_v7, %v2608_v27 }
  0xa2   :  { %v2927_v24 = vpop.permute.xlu0 %2611  ;;  %v1208_v33 = vpop.permute.xlu1 %1207  ;;  %v1001_v37 = vpack.c.bf16 %v987_v31, %v987_v31  ;;  %v986_v39 = vsel %vm985_vm5, %v2609_v26, %v984_v25  ;;  %v1000_v43 = vpack.c.bf16 %v988_v38, %v988_v38 }
  0xa3   :  { %v2614_v40 = vunpack.i.h.bf16 %v2927_v24  ;;  %v1002_v44 = vpack.c.bf16 %v986_v39, %v986_v39  ;;  %v2613_v45 = vunpack.i.l.bf16 %v2927_v24 }
  0xa4   :  { %v1020_v50 = vsel %vm85_vm1, %v1000_v43, 0 }
  0xa5   :  { %v1226_v55 = vsel %vm1219_vm6, %v2613_v45, %v2614_v40 }
  0xa6   :  { %2342 = vmatmul.mubr.msk.bf16.vlgmr.msra.gmra.mrb[0].mxu0 %vm81_vm2, %v2340_v46  ;;  %2344 = vmatmul.mubr.msk.bf16.vlgmr.msra.gmra.mrb[0].mxu1 %vm81_vm2, %v2340_v46  ;;  %v2617_v32 = vpop.permute.xlu0 %2616  ;;  %v1230_v61 = vpack.c.bf16 %v1226_v55, %v1226_v55 }
  0xa7   :  { %646 = vmatpush1.bf16.msra.mxu0 %v552_v47  ;;  %687 = vmatpush1.bf16.msra.mxu1 %v558_v48  ;;  %v2619_v41 = vunpack.i.h.bf16 %v2617_v32  ;;  %v2618_v42 = vunpack.i.l.bf16 %v2617_v32  ;;  %v1225_v48 = vsel %vm1219_vm6, %v2614_v40, %v1208_v33 }
  0xa8   :  { %677 = vmatprep.mubr.bf16.mxu0 %v2716_v11  ;;  %718 = vmatprep.mubr.bf16.mxu1 %v2716_v11  ;;  %v1231_v54 = vpack.c.bf16 %v1225_v48, %v1225_v48  ;;  %v1242_v5 = vsel %vm85_vm1, %v1230_v61, 0 }
  0xa9   :  { %2352 = vmatprep.subr.msk.bf16.mxu1 %vm85_vm1, %v765_v49  ;;  %2350 = vmatprep.subr.msk.bf16.mxu0 %vm85_vm1, %v763_v51  ;;  %v1223_v47 = vsel %vm1219_vm6, %v2618_v42, %v2619_v41  ;;  %v2358_v49 = vld [vmem:[%s3170_s1 + $0x10] sm:$0xf]  ;;  %v1026_v51 = vsel %vm85_vm1, %v1002_v44, 0  ;;  %v1224_v53 = vsel %vm1219_vm6, %v1208_v33, %v2618_v42 }
  0xaa   :  { %v1233_v52 = vpack.c.bf16 %v1223_v47, %v1223_v47  ;;  %v1218_v57 = vpop.permute.xlu0 %1217  ;;  %v1232_v60 = vpack.c.bf16 %v1224_v53, %v1224_v53 }
  0xab   :  { %v1227_v62 = vsel %vm1219_vm6, %v1218_v57, %v2613_v45 }
  0xac   :  { %v1248_v4 = vsel %vm85_vm1, %v1232_v60, 0 }
  0xae   :  { %2346 = vmatmul.mubr.msk.bf16.vlgmr.msra.gmra.mrb[4].mxu0 %vm81_vm2, %v2340_v46  ;;  %2348 = vmatmul.mubr.msk.bf16.vlgmr.msra.gmra.mrb[4].mxu1 %vm81_vm2, %v2340_v46  ;;  %v2622_v46 = vpop.permute.xlu1 %2621 }
  0xaf   :  { %839 = vmatpush1.bf16.msra.mxu1 %v780_v0  ;;  %798 = vmatpush1.bf16.msra.mxu0 %v774_v2  ;;  %v2624_v58 = vunpack.i.h.bf16 %v2622_v46  ;;  %v2623_v59 = vunpack.i.l.bf16 %v2622_v46  ;;  %v1442_v2 = vpop.permute.xlu0 %1441 }
  0xb0   :  { %2356 = vmatprep.subr.msk.bf16.mxu1 %vm85_vm1, %v769_v63  ;;  %829 = vmatprep.mubr.bf16.mxu0 %v2716_v11 }
  0xb1   :  { %870 = vmatprep.mubr.bf16.mxu1 %v2716_v11  ;;  %2354 = vmatprep.subr.msk.bf16.mxu0 %vm85_vm1, %v767_v3  ;;  %v1221_v63 = vsel %vm1219_vm6, %v2623_v59, %v2624_v58  ;;  %v1237_v3 = vpack.c.bf16 %v1227_v62, %v1227_v62  ;;  %v1222_v7 = vsel %vm1219_vm6, %v2619_v41, %v2623_v59 }
  0xb2   :  { %v2967_v56 = vpop.permute.xlu1 %2626  ;;  %v1235_v6 = vpack.c.bf16 %v1221_v63, %v1221_v63  ;;  %v1220_v1 = vsel %vm1219_vm6, %v2624_v58, %v1218_v57  ;;  %v1234_v12 = vpack.c.bf16 %v1222_v7, %v1222_v7 }
  0xb3   :  { %v2629_v8 = vunpack.i.h.bf16 %v2967_v56  ;;  %v1236_v13 = vpack.c.bf16 %v1220_v1, %v1220_v1  ;;  %v2628_v14 = vunpack.i.l.bf16 %v2967_v56 }
  0xb4   :  { %v1254_v21 = vsel %vm85_vm1, %v1234_v12, 0 }
  0xb5   :  { %v1460_v26 = vsel %vm1453_vm7, %v2628_v14, %v2629_v8 }
  0xb6   :  { %2351 = vmatmul.mubr.msk.bf16.vlgmr.msra.gmra.mrb[0].mxu0 %vm81_vm2, %v2349_v15  ;;  %2353 = vmatmul.mubr.msk.bf16.vlgmr.msra.gmra.mrb[0].mxu1 %vm81_vm2, %v2349_v15  ;;  %v2632_v0 = vpop.permute.xlu1 %2631  ;;  %v1464_v32 = vpack.c.bf16 %v1460_v26, %v1460_v26 }
  0xb7   :  { %880 = vmatpush1.bf16.msra.mxu0 %v786_v16  ;;  %921 = vmatpush1.bf16.msra.mxu1 %v792_v18  ;;  %v2634_v9 = vunpack.i.h.bf16 %v2632_v0  ;;  %v2633_v10 = vunpack.i.l.bf16 %v2632_v0  ;;  %v1459_v18 = vsel %vm1453_vm7, %v2629_v8, %v1442_v2 }
  0xb8   :  { %911 = vmatprep.mubr.bf16.mxu0 %v2716_v11  ;;  %952 = vmatprep.mubr.bf16.mxu1 %v2716_v11  ;;  %v1465_v25 = vpack.c.bf16 %v1459_v18, %v1459_v18  ;;  %v1476_v39 = vsel %vm85_vm1, %v1464_v32, 0 }
  0xb9   :  { %2361 = vmatprep.subr.msk.bf16.mxu1 %vm85_vm1, %v999_v20  ;;  %2359 = vmatprep.subr.msk.bf16.mxu0 %vm85_vm1, %v997_v22  ;;  %v1457_v16 = vsel %vm1453_vm7, %v2633_v10, %v2634_v9  ;;  %v2367_v20 = vld [vmem:[%s3170_s1 + $0x14] sm:$0xf]  ;;  %v1260_v22 = vsel %vm85_vm1, %v1236_v13, 0  ;;  %v1458_v24 = vsel %vm1453_vm7, %v1442_v2, %v2633_v10 }
  0xba   :  { %v1467_v23 = vpack.c.bf16 %v1457_v16, %v1457_v16  ;;  %v1452_v28 = vpop.permute.xlu1 %1451  ;;  %v1466_v31 = vpack.c.bf16 %v1458_v24, %v1458_v24 }
  0xbb   :  { %v1461_v33 = vsel %vm1453_vm7, %v1452_v28, %v2628_v14 }
  0xbc   :  { %v1482_v38 = vsel %vm85_vm1, %v1466_v31, 0 }
  0xbe   :  { %2355 = vmatmul.mubr.msk.bf16.vlgmr.msra.gmra.mrb[4].mxu0 %vm81_vm2, %v2349_v15  ;;  %2357 = vmatmul.mubr.msk.bf16.vlgmr.msra.gmra.mrb[4].mxu1 %vm81_vm2, %v2349_v15  ;;  %v2637_v15 = vpop.permute.xlu0 %2636 }
  0xbf   :  { %1073 = vmatpush1.bf16.msra.mxu1 %v1014_v35  ;;  %1032 = vmatpush1.bf16.msra.mxu0 %v1008_v36  ;;  %v2639_v29 = vunpack.i.h.bf16 %v2637_v15  ;;  %v2638_v30 = vunpack.i.l.bf16 %v2637_v15  ;;  %v1676_v36 = vpop.permute.xlu1 %1675 }
  0xc0   :  { %2365 = vmatprep.subr.msk.bf16.mxu1 %vm85_vm1, %v1003_v34  ;;  %1063 = vmatprep.mubr.bf16.mxu0 %v2716_v11 }
  0xc1   :  { %1104 = vmatprep.mubr.bf16.mxu1 %v2716_v11  ;;  %2363 = vmatprep.subr.msk.bf16.mxu0 %vm85_vm1, %v1001_v37  ;;  %v1455_v34 = vsel %vm1453_vm7, %v2638_v30, %v2639_v29  ;;  %v1471_v37 = vpack.c.bf16 %v1461_v33, %v1461_v33  ;;  %v1456_v41 = vsel %vm1453_vm7, %v2634_v9, %v2638_v30 }
  0xc2   :  { %v3007_v27 = vpop.permute.xlu0 %2641  ;;  %v1469_v40 = vpack.c.bf16 %v1455_v34, %v1455_v34  ;;  %v1454_v42 = vsel %vm1453_vm7, %v2639_v29, %v1452_v28  ;;  %v1468_v46 = vpack.c.bf16 %v1456_v41, %v1456_v41 }
  0xc3   :  { %v2644_v43 = vunpack.i.h.bf16 %v3007_v27  ;;  %v1470_v47 = vpack.c.bf16 %v1454_v42, %v1454_v42  ;;  %v2643_v48 = vunpack.i.l.bf16 %v3007_v27 }
  0xc4   :  { %v1488_v53 = vsel %vm85_vm1, %v1468_v46, 0 }
  0xc5   :  { %v1694_v58 = vsel %vm1687_vm8, %v2643_v48, %v2644_v43 }
  0xc6   :  { %2360 = vmatmul.mubr.msk.bf16.vlgmr.msra.gmra.mrb[0].mxu0 %vm81_vm2, %v2358_v49  ;;  %2362 = vmatmul.mubr.msk.bf16.vlgmr.msra.gmra.mrb[0].mxu1 %vm81_vm2, %v2358_v49  ;;  %v2647_v35 = vpop.permute.xlu0 %2646  ;;  %v1698_v0 = vpack.c.bf16 %v1694_v58, %v1694_v58 }
  0xc7   :  { %1114 = vmatpush1.bf16.msra.mxu0 %v1020_v50  ;;  %1155 = vmatpush1.bf16.msra.mxu1 %v1026_v51  ;;  %v2649_v44 = vunpack.i.h.bf16 %v2647_v35  ;;  %v2648_v45 = vunpack.i.l.bf16 %v2647_v35  ;;  %v1693_v51 = vsel %vm1687_vm8, %v2644_v43, %v1676_v36 }
  0xc8   :  { %1145 = vmatprep.mubr.bf16.mxu0 %v2716_v11  ;;  %1186 = vmatprep.mubr.bf16.mxu1 %v2716_v11  ;;  %v1699_v57 = vpack.c.bf16 %v1693_v51, %v1693_v51  ;;  %v1710_v7 = vsel %vm85_vm1, %v1698_v0, 0 }
  0xc9   :  { %2370 = vmatprep.subr.msk.bf16.mxu1 %vm85_vm1, %v1233_v52  ;;  %2368 = vmatprep.subr.msk.bf16.mxu0 %vm85_vm1, %v1231_v54  ;;  %v1691_v50 = vsel %vm1687_vm8, %v2648_v45, %v2649_v44  ;;  %v2376_v52 = vld [vmem:[%s3170_s1 + $0x18] sm:$0xf]  ;;  %v1494_v54 = vsel %vm85_vm1, %v1470_v47, 0  ;;  %v1692_v56 = vsel %vm1687_vm8, %v1676_v36, %v2648_v45  ;;  %v2143_v47 = vsub.s32 0, %v2782_v19 }
  0xca   :  { %v1701_v55 = vpack.c.bf16 %v1691_v50, %v1691_v50  ;;  %v1686_v60 = vpop.permute.xlu0 %1685  ;;  %v1700_v63 = vpack.c.bf16 %v1692_v56, %v1692_v56  ;;  %v2151_v50 = vsub.s32 2, %v2782_v19 }
  0xcb   :  { %v1695_v2 = vsel %vm1687_vm8, %v1686_v60, %v2643_v48  ;;  %v2139_v48 = vld [vmem:[%s3174_s5] sm:$0xff] }
  0xcc   :  { %v2144_v51 = vrot.slane %v2139_v48, %v2143_v47 }
  0xce   :  { %2364 = vmatmul.mubr.msk.bf16.vlgmr.msra.gmra.mrb[4].mxu0 %vm81_vm2, %v2358_v49  ;;  %2366 = vmatmul.mubr.msk.bf16.vlgmr.msra.gmra.mrb[4].mxu1 %vm81_vm2, %v2358_v49  ;;  %v2652_v49 = vpop.permute.xlu1 %2651  ;;  %v1910_v10 = vpop.permute.xlu0 %1909 }
  0xcf   :  { %1307 = vmatpush1.bf16.msra.mxu1 %v1248_v4  ;;  %1266 = vmatpush1.bf16.msra.mxu0 %v1242_v5  ;;  %v2654_v61 = vunpack.i.h.bf16 %v2652_v49  ;;  %v2653_v62 = vunpack.i.l.bf16 %v2652_v49  ;;  %v1705_v5 = vpack.c.bf16 %v1695_v2, %v1695_v2  ;;  %v2147_v49 = vsub.s32 1, %v2782_v19 }
  0xd0   :  { %2374 = vmatprep.subr.msk.bf16.mxu1 %vm85_vm1, %v1237_v3  ;;  %1297 = vmatprep.mubr.bf16.mxu0 %v2716_v11 }
  0xd1   :  { %1338 = vmatprep.mubr.bf16.mxu1 %v2716_v11  ;;  %2372 = vmatprep.subr.msk.bf16.mxu0 %vm85_vm1, %v1235_v6  ;;  %v1689_v3 = vsel %vm1687_vm8, %v2653_v62, %v2654_v61  ;;  %v1716_v6 = vsel %vm85_vm1, %v1700_v63, 0  ;;  %v1690_v8 = vsel %vm1687_vm8, %v2649_v44, %v2653_v62  ;;  %v1688_v9 = vsel %vm1687_vm8, %v2654_v61, %v1686_v60 }
  0xd2   :  { %v2657_v59 = vpop.permute.xlu1 %2656  ;;  %v1703_v1 = vpack.c.bf16 %v1689_v3, %v1689_v3  ;;  %v1702_v15 = vpack.c.bf16 %v1690_v8, %v1690_v8  ;;  %v1704_v16 = vpack.c.bf16 %v1688_v9, %v1688_v9  ;;  %v2159_v60 = vsub.s32 4, %v2782_v19 }
  0xd3   :  { %v2659_v12 = vunpack.i.h.bf16 %v2657_v59  ;;  %v2658_v18 = vunpack.i.l.bf16 %v2657_v59  ;;  %v2163_v61 = vsub.s32 5, %v2782_v19 }
  0xd4   :  { %v1722_v24 = vsel %vm85_vm1, %v1702_v15, 0 }
  0xd5   :  { %v1928_v29 = vsel %vm1921_vm9, %v2658_v18, %v2659_v12 }
  0xd6   :  { %2369 = vmatmul.mubr.msk.bf16.vlgmr.msra.gmra.mrb[0].mxu0 %vm81_vm2, %v2367_v20  ;;  %2371 = vmatmul.mubr.msk.bf16.vlgmr.msra.gmra.mrb[0].mxu1 %vm81_vm2, %v2367_v20  ;;  %v2662_v4 = vpop.permute.xlu1 %2661  ;;  %v1932_v34 = vpack.c.bf16 %v1928_v29, %v1928_v29 }
  0xd7   :  { %1348 = vmatpush1.bf16.msra.mxu0 %v1254_v21  ;;  %1389 = vmatpush1.bf16.msra.mxu1 %v1260_v22  ;;  %v2664_v13 = vunpack.i.h.bf16 %v2662_v4  ;;  %v2663_v14 = vunpack.i.l.bf16 %v2662_v4  ;;  %v1927_v21 = vsel %vm1921_vm9, %v2659_v12, %v1910_v10  ;;  %v2385_v22 = vld [vmem:[%s3170_s1 + $0x1c] sm:$0xf]  ;;  %v2160_v12 = vrot.slane %v2139_v48, %v2159_v60 }
  0xd8   :  { %1379 = vmatprep.mubr.bf16.mxu0 %v2716_v11  ;;  %1420 = vmatprep.mubr.bf16.mxu1 %v2716_v11  ;;  %v1933_v28 = vpack.c.bf16 %v1927_v21, %v1927_v21  ;;  %v2171_v21 = vsub.s32 7, %v2782_v19 }
  0xd9   :  { %2379 = vmatprep.subr.msk.bf16.mxu1 %vm85_vm1, %v1467_v23  ;;  %2377 = vmatprep.subr.msk.bf16.mxu0 %vm85_vm1, %v1465_v25  ;;  %v2667_v23 = vpop.permute.xlu0 %2666  ;;  %v1728_v25 = vsel %vm85_vm1, %v1704_v16, 0  ;;  %v1926_v27 = vsel %vm1921_vm9, %v1910_v10, %v2663_v14 }
  0xda   :  { %v1920_v30 = vpop.permute.xlu1 %1919  ;;  %v2669_v31 = vunpack.i.h.bf16 %v2667_v23  ;;  %v2668_v32 = vunpack.i.l.bf16 %v2667_v23  ;;  %v1934_v33 = vpack.c.bf16 %v1926_v27, %v1926_v27 }
  0xdb   :  { %v1929_v35 = vsel %vm1921_vm9, %v1920_v30, %v2658_v18 }
  0xdc   :  { %v1923_v36 = vsel %vm1921_vm9, %v2668_v32, %v2669_v31  ;;  %v1924_v41 = vsel %vm1921_vm9, %v2664_v13, %v2668_v32  ;;  %v1922_v42 = vsel %vm1921_vm9, %v2669_v31, %v1920_v30 }
  0xdd   :  { %v1936_v43 = vpack.c.bf16 %v1924_v41, %v1924_v41  ;;  %v1938_v44 = vpack.c.bf16 %v1922_v42, %v1922_v42  ;;  %v2172_v41 = vrot.slane %v2139_v48, %v2171_v21 }
  0xde   :  { %2373 = vmatmul.mubr.msk.bf16.vlgmr.msra.gmra.mrb[4].mxu0 %vm81_vm2, %v2367_v20  ;;  %2375 = vmatmul.mubr.msk.bf16.vlgmr.msra.gmra.mrb[4].mxu1 %vm81_vm2, %v2367_v20  ;;  %v1925_v20 = vsel %vm1921_vm9, %v2663_v14, %v2664_v13  ;;  %v2167_v13 = vsub.s32 6, %v2782_v19  ;;  %v2164_v14 = vrot.slane %v2139_v48, %v2163_v61 }
  0xdf   :  { %1541 = vmatpush1.bf16.msra.mxu1 %v1482_v38  ;;  %1500 = vmatpush1.bf16.msra.mxu0 %v1476_v39  ;;  %v1935_v26 = vpack.c.bf16 %v1925_v20, %v1925_v20  ;;  %v1950_v38 = vsel %vm85_vm1, %v1934_v33, 0  ;;  %v1944_v39 = vsel %vm85_vm1, %v1932_v34, 0  ;;  %v1956_v45 = vsel %vm85_vm1, %v1936_v43, 0 }
  0xe0   :  { %2383 = vmatprep.subr.msk.bf16.mxu1 %vm85_vm1, %v1471_v37  ;;  %1531 = vmatprep.mubr.bf16.mxu0 %v2716_v11  ;;  %v1939_v37 = vpack.c.bf16 %v1929_v35, %v1929_v35  ;;  %v1962_v46 = vsel %vm85_vm1, %v1938_v44, 0  ;;  %v2168_v29 = vrot.slane %v2139_v48, %v2167_v13 }
  0xe1   :  { %1572 = vmatprep.mubr.bf16.mxu1 %v2716_v11  ;;  %2381 = vmatprep.subr.msk.bf16.mxu0 %vm85_vm1, %v1469_v40  ;;  %v1937_v40 = vpack.c.bf16 %v1923_v36, %v1923_v36 }
  0xe6   :  { %2378 = vmatmul.mubr.msk.bf16.vlgmr.msra.gmra.mrb[0].mxu0 %vm81_vm2, %v2376_v52  ;;  %2380 = vmatmul.mubr.msk.bf16.vlgmr.msra.gmra.mrb[0].mxu1 %vm81_vm2, %v2376_v52 }
  0xe7   :  { %1582 = vmatpush1.bf16.msra.mxu0 %v1488_v53  ;;  %1623 = vmatpush1.bf16.msra.mxu1 %v1494_v54  ;;  %v2155_v53 = vsub.s32 3, %v2782_v19 }
  0xe8   :  { %1613 = vmatprep.mubr.bf16.mxu0 %v2716_v11  ;;  %1654 = vmatprep.mubr.bf16.mxu1 %v2716_v11 }
  0xe9   :  { %2388 = vmatprep.subr.msk.bf16.mxu1 %vm85_vm1, %v1701_v55  ;;  %2386 = vmatprep.subr.msk.bf16.mxu0 %vm85_vm1, %v1699_v57  ;;  %v2152_v55 = vrot.slane %v2139_v48, %v2151_v50  ;;  %v2156_v2 = vrot.slane %v2139_v48, %v2155_v53 }
  0xee   :  { %2382 = vmatmul.mubr.msk.bf16.vlgmr.msra.gmra.mrb[4].mxu0 %vm81_vm2, %v2376_v52  ;;  %2384 = vmatmul.mubr.msk.bf16.vlgmr.msra.gmra.mrb[4].mxu1 %vm81_vm2, %v2376_v52  ;;  %v2148_v52 = vrot.slane %v2139_v48, %v2147_v49 }
  0xef   :  { %1775 = vmatpush1.bf16.msra.mxu1 %v1716_v6  ;;  %1734 = vmatpush1.bf16.msra.mxu0 %v1710_v7 }
  0xf0   :  { %2392 = vmatprep.subr.msk.bf16.mxu1 %vm85_vm1, %v1705_v5  ;;  %1765 = vmatprep.mubr.bf16.mxu0 %v2716_v11 }
  0xf1   :  { %1806 = vmatprep.mubr.bf16.mxu1 %v2716_v11  ;;  %2390 = vmatprep.subr.msk.bf16.mxu0 %vm85_vm1, %v1703_v1 }
  0xf6   :  { %2387 = vmatmul.mubr.msk.bf16.vlgmr.msra.gmra.mrb[0].mxu0 %vm81_vm2, %v2385_v22  ;;  %2389 = vmatmul.mubr.msk.bf16.vlgmr.msra.gmra.mrb[0].mxu1 %vm81_vm2, %v2385_v22 }
  0xf7   :  { %1816 = vmatpush1.bf16.msra.mxu0 %v1722_v24  ;;  %1857 = vmatpush1.bf16.msra.mxu1 %v1728_v25 }
  0xf8   :  { %1847 = vmatprep.mubr.bf16.mxu0 %v2716_v11  ;;  %1888 = vmatprep.mubr.bf16.mxu1 %v2716_v11 }
  0xf9   :  { %2397 = vmatprep.subr.msk.bf16.mxu1 %vm85_vm1, %v1935_v26  ;;  %2395 = vmatprep.subr.msk.bf16.mxu0 %vm85_vm1, %v1933_v28 }
  0xfe   :  { %2391 = vmatmul.mubr.msk.bf16.vlgmr.msra.gmra.mrb[4].mxu0 %vm81_vm2, %v2385_v22  ;;  %2393 = vmatmul.mubr.msk.bf16.vlgmr.msra.gmra.mrb[4].mxu1 %vm81_vm2, %v2385_v22 }
  0xff   :  { %2009 = vmatpush1.bf16.msra.mxu1 %v1950_v38  ;;  %1968 = vmatpush1.bf16.msra.mxu0 %v1944_v39 }
 0x100   :  { %2401 = vmatprep.subr.msk.bf16.mxu1 %vm85_vm1, %v1939_v37  ;;  %1999 = vmatprep.mubr.bf16.mxu0 %v2716_v11 }
 0x101   :  { %2040 = vmatprep.mubr.bf16.mxu1 %v2716_v11  ;;  %2399 = vmatprep.subr.msk.bf16.mxu0 %vm85_vm1, %v1937_v40 }
 0x106   :  { %2396 = vmatmul.mubr.msk.bf16.vlgmr.msra.gmra.mrb[0].mxu0 %vm81_vm2, %v2394_v17  ;;  %2398 = vmatmul.mubr.msk.bf16.vlgmr.msra.gmra.mrb[0].mxu1 %vm81_vm2, %v2394_v17 }
 0x107   :  { %2050 = vmatpush1.bf16.msra.mxu0 %v1956_v45  ;;  %2091 = vmatpush1.bf16.msra.mxu1 %v1962_v46 }
 0x108   :  { %2081 = vmatprep.mubr.bf16.mxu0 %v2716_v11  ;;  %2122 = vmatprep.mubr.bf16.mxu1 %v2716_v11 }
 0x10e   :  { %2400 = vmatmul.mubr.msk.bf16.vlgmr.msra.gmra.mrb[4].mxu0 %vm81_vm2, %v2394_v17  ;;  %2402 = vmatmul.mubr.msk.bf16.vlgmr.msra.gmra.mrb[4].mxu1 %vm81_vm2, %v2394_v17 }
 0x1d9   :  { %v3123_v54 = vpop.f32.mrb[0].mxu0  ;;  %v3125_v11 = vpop.f32.mrb[0].mxu1 }
 0x1da   :  { %v2181_v56 = vmul.f32 %v2144_v51, %v3123_v54  ;;  %v2198_v57 = vmul.f32 %v3123_v54, %v3123_v54  ;;  %v3130_v58 = vpop.f32.mrb[1].mxu0  ;;  %v3132_v59 = vpop.f32.mrb[1].mxu1  ;;  %v2200_v62 = vmul.f32 %v3125_v11, %v3125_v11  ;;  %v2183_v1 = vmul.f32 %v2152_v55, %v3125_v11 }
 0x1db   :  { %v2182_v63 = vmul.f32 %v2148_v52, %v3130_v58  ;;  %v2199_v0 = vmul.f32 %v3130_v58, %v3130_v58  ;;  %v2005_v3 = vpop.f32.mrb[2].mxu0  ;;  %v2046_v4 = vpop.f32.mrb[2].mxu1  ;;  %v2201_v10 = vmul.f32 %v3132_v59, %v3132_v59  ;;  %v2184_v18 = vmul.f32 %v2156_v2, %v3132_v59 }
 0x1dc   :  { %v2206_v5 = vmul.f32 %v2198_v57, %v2144_v51  ;;  %v2006_v6 = vpop.f32.mrb[3].mxu0  ;;  %v2047_v7 = vpop.f32.mrb[3].mxu1  ;;  %v2208_v15 = vmul.f32 %v2200_v62, %v2152_v55  ;;  %v2232_v4 = vld [vmem:[%s3173_s4] sm:$0xff] }
 0x1dd   :  { %v2189_v8 = vadd.f32 %v2182_v63, %v2181_v56  ;;  %v2207_v9 = vmul.f32 %v2199_v0, %v2148_v52  ;;  %v2209_v23 = vmul.f32 %v2201_v10, %v2156_v2  ;;  %v2228_v0 = vld [vmem:[%s3172_s3] sm:$0xff]  ;;  %s2726_s3 = smov [#allocation2]  }
 0x1de   :  { %s2315_s4 = sshll.u32 %s2726_s3, 4  ;;  %s2316_s4 = int_to_ptr.vmem [resolvable:$true] %s2315_s4 }
 0x1df   :  { %v2214_v16 = vadd.f32 %v2207_v9, %v2206_v5  ;;  %v2190_v20 = vadd.f32 %v2189_v8, %v2183_v1  ;;  %s2692_s27 = scalar_lea.vmem %s2316_s4, 1024  ;;  %p2697_p1 = scmp.lt.s32.totalorder %s2316_s4, %s2316_s4 }
 0x1e0   :  { %p2693_p0 = scmp.ne.s32.totalorder %s2316_s4, %s2692_s27  ;;  %p2698_p2 = scmp.lt.s32.totalorder %s2692_s27, %s2692_s27 }
 0x1e1   :  { %v2191_v22 = vadd.f32 %v2190_v20, %v2184_v18  ;;  %v2215_v24 = vadd.f32 %v2214_v16, %v2208_v15  ;;  %v2083_v25 = vpop.f32.mrb[4].mxu0  ;;  %v2124_v26 = vpop.f32.mrb[4].mxu1 }
 0x1e2   :  { %v2185_v27 = vmul.f32 %v2160_v12, %v2083_v25  ;;  %v2202_v28 = vmul.f32 %v2083_v25, %v2083_v25  ;;  %v2085_v30 = vpop.f32.mrb[5].mxu0  ;;  %v2126_v31 = vpop.f32.mrb[5].mxu1  ;;  %v2204_v39 = vmul.f32 %v2124_v26, %v2124_v26  ;;  %v2187_v43 = vmul.f32 %v2168_v29, %v2124_v26  ;;  %p2699_p3 = por %p2698_p2, %p2697_p1 }
 0x1e3   :  { %v2216_v32 = vadd.f32 %v2215_v24, %v2209_v23  ;;  %v2186_v33 = vmul.f32 %v2164_v14, %v2085_v30  ;;  %v2203_v34 = vmul.f32 %v2085_v30, %v2085_v30  ;;  %v2087_v35 = vpop.f32.mrb[6].mxu0  ;;  %v2128_v36 = vpop.f32.mrb[6].mxu1  ;;  %v2205_v44 = vmul.f32 %v2126_v31, %v2126_v31 }
 0x1e4   :  { %v2192_v37 = vadd.f32 %v2191_v22, %v2185_v27  ;;  %v2210_v38 = vmul.f32 %v2202_v28, %v2160_v12  ;;  %v2088_v40 = vpop.f32.mrb[7].mxu0  ;;  %v2129_v19 = vpop.f32.mrb[7].mxu1  ;;  %v2188_v46 = vmul.f32 %v2172_v41, %v2126_v31  ;;  %v2212_v49 = vmul.f32 %v2204_v39, %v2168_v29  ;;  %p2700_p4 = pnand %p2699_p3, %p2693_p0 }
 0x1e5   :  { %v2211_v42 = vmul.f32 %v2203_v34, %v2164_v14  ;;  %v2213_v52 = vmul.f32 %v2205_v44, %v2172_v41 }
 0x1e6   :  { %v2193_v17 = vadd.f32 %v2192_v37, %v2186_v33  ;;  %v2217_v45 = vadd.f32 %v2216_v32, %v2210_v38 }
 0x1e8   :  { %v2194_v47 = vadd.f32 %v2193_v17, %v2187_v43  ;;  %v2218_v50 = vadd.f32 %v2217_v45, %v2211_v42 }
 0x1ea   :  { %v2195_v51 = vadd.f32 %v2194_v47, %v2188_v46  ;;  %v2219_v53 = vadd.f32 %v2218_v50, %v2212_v49 }
 0x1ec   :  { %2196 = vadd.xlane.f32.xlu0 %v2195_v51  ;;  %v2220_v55 = vadd.f32 %v2219_v53, %v2213_v52 }
 0x1ee   :  { %2221 = vadd.xlane.f32.xlu1 %v2220_v55 }
 0x279   :  { %v2197_v56 = vpop.xlane.xlu0 %2196 }
 0x27a   :  { %v2224_v57 = vmul.f32 0.0015432099, %v2197_v56 }
 0x27b   :  { %v2222_v60 = vpop.xlane.xlu1 %2221 }
 0x27c   :  { %v2226_v61 = vmul.f32 %v2224_v57, %v2224_v57  ;;  %v2225_v48 = vmul.f32 0.0015432099, %v2222_v60 }
 0x27e   :  { %v2227_v62 = vsub.f32 %v2225_v48, %v2226_v61 }
 0x280   :  { %v2229_v63 = vadd.f32 1e-05, %v2227_v62 }
 0x282   :  { %2674 = vrsqrt.f32 %v2229_v63 }
 0x28c   :  { %v2675_v2 = vpop.eup %2674 }
 0x28d   :  { %v2231_v3 = vmul.f32 %v2675_v2, %v2228_v0 }
 0x28f   :  { %2237 = vperm.xlu0 %2670, %v2231_v3   ;;  %v2233_v5 = vmul.f32 %v2231_v3, %v2224_v57 }
 0x291   :  { %v2234_v6 = vsub.f32 %v2232_v4, %v2233_v5 }
 0x293   :  { %2250 = vperm.xlu1 %2671, %v2234_v6  }
 0x30e   :  { %v2238_v7 = vpop.permute.xlu0 %2237 }
 0x30f   :  { %v2240_v1 = vmul.f32 %v2238_v7, %v3123_v54  ;;  %v2241_v8 = vmul.f32 %v2238_v7, %v3130_v58  ;;  %v2242_v9 = vmul.f32 %v2238_v7, %v3125_v11  ;;  %v2243_v10 = vmul.f32 %v2238_v7, %v3132_v59 }
 0x310   :  { %v2244_v13 = vmul.f32 %v2238_v7, %v2083_v25  ;;  %v2245_v18 = vmul.f32 %v2238_v7, %v2085_v30  ;;  %v2246_v21 = vmul.f32 %v2238_v7, %v2124_v26  ;;  %v2247_v23 = vmul.f32 %v2238_v7, %v2126_v31 }
 0x312   :  { %v2251_v12 = vpop.permute.xlu1 %2250 }
 0x313   :  { %v2253_v14 = vadd.f32 %v2251_v12, %v2240_v1  ;;  %v2254_v15 = vadd.f32 %v2251_v12, %v2241_v8  ;;  %v2255_v16 = vadd.f32 %v2251_v12, %v2242_v9  ;;  %v2256_v20 = vadd.f32 %v2251_v12, %v2243_v10 }
 0x314   :  { %v2257_v22 = vadd.f32 %v2251_v12, %v2244_v13  ;;  %v2258_v24 = vadd.f32 %v2251_v12, %v2245_v18  ;;  %v2259_v27 = vadd.f32 %v2251_v12, %v2246_v21  ;;  %v2260_v58 = vadd.f32 %v2251_v12, %v2247_v23 }
 0x315   :  { %v2269_v28 = vmul.f32 1.442695, %v2253_v14  ;;  %v2271_v54 = vmul.f32 1.442695, %v2254_v15  ;;  %v2273_v29 = vmul.f32 1.442695, %v2255_v16 }
 0x316   :  { %v2275_v32 = vmul.f32 1.442695, %v2256_v20  ;;  %v2277_v11 = vmul.f32 1.442695, %v2257_v22  ;;  %v2279_v59 = vmul.f32 1.442695, %v2258_v24 }
 0x317   :  { %2676 = vpow2.f32 %v2269_v28  ;;  %v2281_v25 = vmul.f32 1.442695, %v2259_v27  ;;  %v2283_v33 = vmul.f32 1.442695, %v2260_v58  ;;  %vm2261_vm10 = vcmp.gt.f32.partialorder %v2253_v14, 0.0 }
 0x318   :  { %2678 = vpow2.f32 %v2271_v54  ;;  %vm2262_vm11 = vcmp.gt.f32.partialorder %v2254_v15, 0.0  ;;  %vm2263_vm12 = vcmp.gt.f32.partialorder %v2255_v16, 0.0  ;;  %vm2264_vm13 = vcmp.gt.f32.partialorder %v2256_v20, 0.0 }
 0x319   :  { %2680 = vpow2.f32 %v2273_v29  ;;  %vm2265_vm14 = vcmp.gt.f32.partialorder %v2257_v22, 0.0  ;;  %vm2266_vm15 = vcmp.gt.f32.partialorder %v2258_v24, 0.0  ;;  %vm2267_vm0 = vcmp.gt.f32.partialorder %v2259_v27, 0.0 }
 0x31a   :  { %2682 = vpow2.f32 %v2275_v32  ;;  %vm2268_vm1 = vcmp.gt.f32.partialorder %v2260_v58, 0.0 }
 0x31b   :  { %2684 = vpow2.f32 %v2277_v11 }
 0x31c   :  { %2686 = vpow2.f32 %v2279_v59 }
 0x31d   :  { %2688 = vpow2.f32 %v2281_v25 }
 0x31e   :  { %2690 = vpow2.f32 %v2283_v33 }
 0x321   :  { %v2677_v26 = vpop.eup %2676 }
 0x322   :  { %v2679_v30 = vpop.eup %2678  ;;  %v2403_v31 = vadd.f32 -1.0, %v2677_v26 }
 0x323   :  { %v2681_v34 = vpop.eup %2680  ;;  %v2404_v35 = vadd.f32 -1.0, %v2679_v30 }
 0x324   :  { %v2683_v36 = vpop.eup %2682  ;;  %v2405_v37 = vadd.f32 -1.0, %v2681_v34  ;;  %v2293_v38 = vsel %vm2261_vm10, %v2253_v14, %v2403_v31 }
 0x325   :  { %v2685_v39 = vpop.eup %2684  ;;  %v2406_v40 = vadd.f32 -1.0, %v2683_v36  ;;  %v2294_v19 = vsel %vm2262_vm11, %v2254_v15, %v2404_v35  ;;  %2301 = vst [vmem:[#allocation2] sm:$0xff] %v2293_v38 }
 0x326   :  { %v2687_v41 = vpop.eup %2686  ;;  %v2407_v42 = vadd.f32 -1.0, %v2685_v39  ;;  %v2295_v43 = vsel %vm2263_vm12, %v2255_v16, %v2405_v37  ;;  %2302 = vst [vmem:[#allocation2 + $0x8] sm:$0xff] %v2294_v19 }
 0x327   :  { %v2689_v44 = vpop.eup %2688  ;;  %v2408_v17 = vadd.f32 -1.0, %v2687_v41  ;;  %v2296_v45 = vsel %vm2264_vm13, %v2256_v20, %v2406_v40  ;;  %2303 = vst [vmem:[#allocation2 + $0x10] sm:$0xff] %v2295_v43 }
 0x328   :  { %v2691_v46 = vpop.eup %2690  ;;  %v2409_v47 = vadd.f32 -1.0, %v2689_v44  ;;  %v2297_v49 = vsel %vm2265_vm14, %v2257_v22, %v2407_v42  ;;  %2304 = vst [vmem:[#allocation2 + $0x18] sm:$0xff] %v2296_v45 }
 0x329   :  { %v2410_v50 = vadd.f32 -1.0, %v2691_v46  ;;  %v2298_v51 = vsel %vm2266_vm15, %v2258_v24, %v2408_v17  ;;  %2305 = vst [vmem:[#allocation2 + $0x20] sm:$0xff] %v2297_v49 }
 0x32a   :  { %v2299_v52 = vsel %vm2267_vm0, %v2259_v27, %v2409_v47  ;;  %2306 = vst [vmem:[#allocation2 + $0x28] sm:$0xff] %v2298_v51 }
 0x32b   :  { %v2300_v53 = vsel %vm2268_vm1, %v2260_v58, %v2410_v50  ;;  %2307 = vst [vmem:[#allocation2 + $0x30] sm:$0xff] %v2299_v52 }
 0x32c   :  { %2308 = vst [vmem:[#allocation2 + $0x38] sm:$0xff] %v2300_v53 }
 0x32d   :  { %2703 = shalt.err (!%p2700_p4)
}
 0x32e   :  { %s2704_s30 = scalar_lea.hbm %s3175_s6, 1024 }
 0x32f   :  { %p2705_p5 = scmp.ne.s32.totalorder %s3175_s6, %s2704_s30  ;;  %p2708_p6 = scmp.lt.u32.totalorder %s2704_s30, %s3175_s6 }
 0x331   :  { %p2710_p7 = pnand %p2708_p6, %p2705_p5 }
 0x333   :  { %2713 = shalt.err (!%p2710_p7)
}
 0x334   :  { %2318 = dma.vmem_to_hbm [thread:$0]  %s2316_s4, 1024, %s3175_s6, [#allocation3]  }
 0x335   :  { %2714 = dma.done.wait [#allocation3], 1024  }
 0x336   :  { %2715 = vsyncadd [#allocation3], 4294966272 }
 0x337   :  { %2322 = vsyncpa [#allocation3], 1 }

</bundles_post_ra>
